<compile_context>
chip_gen: v5e
topology: v5e:2x2
jax: 0.10.0
libtpu: 0.0.40
codegen_flags: <defaults>
</compile_context>

<pallas_src>
import functools

import numpy as np

import jax
import jax.numpy as jnp
from jax.experimental import pallas as pl
from jax.experimental.pallas import tpu as pltpu

EMBED_DIM = 32
BATCH = 2
TEMPERATURE = 0.05


def _simclr_loss_kernel(z1_ref, z2_ref, w_ref, b_ref, loss_ref, *,
                        temperature, replace_nan, mxu_bf16):
    f32 = jnp.float32
    mxu_dtype = jnp.bfloat16 if mxu_bf16 else jnp.float32
    # bf16 operands are MXU-native on v5e/v6e/v7x; the f32 parity mode forces the
    # full-accuracy multi-pass decomposition.
    prec = None if mxu_bf16 else jax.lax.Precision.HIGHEST

    def mm(a, bm):
        # Contract the LAST dim of both operands (a @ bm.T) so no transpose is
        # ever materialized (used for both the predictor Linear and the sims).
        return jax.lax.dot_general(
            a.astype(mxu_dtype), bm.astype(mxu_dtype),
            dimension_numbers=(((1,), (1,)), ((), ())),
            precision=prec, preferred_element_type=jnp.float32)

    w = w_ref[...]            # (D, D) torch Linear weight, (out, in) layout
    b = b_ref[...]            # (1, D)

    def predict_normalize(z):
        # predictor: Linear + Tanh, then F.normalize(dim=1, eps=1e-12) via
        # rsqrt of the clamped sum-of-squares (EUP rsqrt + VPU mul).
        p = jnp.tanh(mm(z, w) + b)                                  # (B, D) f32
        ss = jnp.sum(p * p, axis=1, keepdims=True)
        return p * jax.lax.rsqrt(jnp.maximum(ss, f32(1e-24)))

    f1 = predict_normalize(z1_ref[...]).astype(mxu_dtype)           # (B, D)
    f2 = predict_normalize(z2_ref[...]).astype(mxu_dtype)           # (B, D)

    inv_t = f32(1.0 / temperature)
    neg_big = f32(-1e30)

    def logits_of(sim):
        # temperature scale + (optional) torch bug-parity NaN replacement,
        # folded into one elementwise expression.
        x = sim * inv_t
        if replace_nan:
            x = jnp.where(jnp.isnan(x), f32(1e-4), x)
        return x

    # Block-wise similarity logits (the stacked (2B, 2B) matrix is never built).
    s11 = logits_of(mm(f1, f1))    # (B, B)
    s12 = logits_of(mm(f1, f2))
    s21 = logits_of(mm(f2, f1))
    s22 = logits_of(mm(f2, f2))

    # In-kernel diagonal exclusion (torch drops sim[i, i] before the softmax).
    bsz = s11.shape[0]
    row = jax.lax.broadcasted_iota(jnp.int32, (bsz, bsz), 0)
    col = jax.lax.broadcasted_iota(jnp.int32, (bsz, bsz), 1)
    diag = row == col
    a11 = jnp.where(diag, neg_big, s11)
    a22 = jnp.where(diag, neg_big, s22)

    def row_lse(left, right):
        m = jnp.maximum(jnp.max(left, axis=1, keepdims=True),
                        jnp.max(right, axis=1, keepdims=True))
        se = (jnp.sum(jnp.exp(left - m), axis=1, keepdims=True) +
              jnp.sum(jnp.exp(right - m), axis=1, keepdims=True))
        return m + jnp.log(se)                                       # (B, 1)

    lse1 = row_lse(a11, s12)       # rows 0 .. B-1   of the stacked view
    lse2 = row_lse(s21, a22)       # rows B .. 2B-1

    # Positive ("target") logit per row, computed directly as a row-wise dot
    # dot(f1[i], f2[i]) / T (identical for rows i and i+B).  Same MXU-precision
    # operands as the sims, so it matches the corresponding s12/s21 entry.
    pos = logits_of(jnp.sum(f1.astype(f32) * f2.astype(f32),
                            axis=1, keepdims=True))                  # (B, 1)
    # torch quirk labels[0] = 1: row 0 targets its FIRST negative, i.e. sim[0, 1].
    t0 = logits_of(jnp.sum(f1[0:1, :].astype(f32) * f1[1:2, :].astype(f32),
                           axis=1, keepdims=True))                   # (1, 1)

    # mean over the 2B rows of (logsumexp - target);
    # sum(targets) = 2*sum(pos) - pos[0] + t0.
    total = (jnp.sum(lse1) + jnp.sum(lse2)
             - 2.0 * jnp.sum(pos) + jnp.sum(pos[0:1, :]) - jnp.sum(t0))
    loss_ref[0, 0] = total * f32(1.0 / (2 * bsz))


@functools.partial(jax.jit,
                   static_argnames=("temperature", "replace_nan", "mxu_bf16"))
def simclr_loss(z1, z2, w, b, temperature=TEMPERATURE, replace_nan=True,
                mxu_bf16=True):
    """z1, z2: (B, D) encoder outputs.  w: (D, D) torch Linear weight.  b: (D,)."""
    batch, _ = z1.shape
    if batch < 2:
        raise ValueError("SimCLR reference semantics (labels[0]=1) require batch >= 2.")

    z1 = jnp.asarray(z1, jnp.float32)
    z2 = jnp.asarray(z2, jnp.float32)
    w = jnp.asarray(w, jnp.float32)
    b2d = jnp.asarray(b, jnp.float32).reshape(1, -1)

    kernel = functools.partial(
        _simclr_loss_kernel,
        temperature=float(temperature),
        replace_nan=bool(replace_nan),
        mxu_bf16=bool(mxu_bf16),
    )
    out = pl.pallas_call(
        kernel,
        out_shape=jax.ShapeDtypeStruct((1, 1), jnp.float32),
        in_specs=[pl.BlockSpec(memory_space=pltpu.MemorySpace.VMEM)] * 4,
        out_specs=pl.BlockSpec(memory_space=pltpu.MemorySpace.SMEM),
    )(z1, z2, w, b2d)
    return out[0, 0]


def _reference_loss_numpy(z1, z2, w, b, temperature=TEMPERATURE, mxu_bf16=False):
    """Numpy re-implementation of the PyTorch forward.  When mxu_bf16=True the
    MXU-operand bf16 rounding of the kernel is emulated (f32 accumulation)."""
    z1, z2, w, b = (np.asarray(a, np.float32) for a in (z1, z2, w, b))

    def cast(a):
        if mxu_bf16:
            return np.asarray(jnp.asarray(a, jnp.bfloat16).astype(jnp.float32))
        return a

    p1 = np.tanh(cast(z1) @ cast(w).T + b)
    p2 = np.tanh(cast(z2) @ cast(w).T + b)
    feats = np.concatenate([p1, p2], axis=0)
    feats = feats / np.maximum(np.linalg.norm(feats, axis=1, keepdims=True), 1e-12)
    fmm = cast(feats)
    sim = fmm @ fmm.T

    n = feats.shape[0]
    bsz = n // 2
    labels = np.concatenate([np.arange(bsz)] * 2)
    lab = (labels[None, :] == labels[:, None]).astype(np.float32)
    mask = np.eye(n, dtype=bool)
    lab = lab[~mask].reshape(n, n - 1)
    sim = sim[~mask].reshape(n, n - 1)
    pos = sim[lab.astype(bool)].reshape(n, -1)
    neg = sim[~lab.astype(bool)].reshape(n, -1)
    logits = np.concatenate([pos, neg], axis=1) / temperature
    logits = np.where(np.isnan(logits), 1e-4, logits)
    targets = np.zeros(n, dtype=np.int64)
    targets[0] = 1
    m = logits.max(axis=1, keepdims=True)
    logp = logits - m - np.log(np.exp(logits - m).sum(axis=1, keepdims=True))
    return float(-np.mean(logp[np.arange(n), targets]))


if __name__ == "__main__":
    key = jax.random.PRNGKey(0)
    k1, k2, k3, k4 = jax.random.split(key, 4)

    # deterministic synthetic inputs / parameters (torch Linear default init range)
    z1 = jax.random.normal(k1, (BATCH, EMBED_DIM), jnp.float32)
    z2 = jax.random.normal(k2, (BATCH, EMBED_DIM), jnp.float32)
    bound = 1.0 / np.sqrt(EMBED_DIM)
    w = jax.random.uniform(k3, (EMBED_DIM, EMBED_DIM), jnp.float32, -bound, bound)
    b = jax.random.uniform(k4, (EMBED_DIM,), jnp.float32, -bound, bound)

    # 1) full-f32 parity mode: semantics of the torch module.
    loss_f32 = jax.block_until_ready(simclr_loss(z1, z2, w, b, mxu_bf16=False))
    ref_f32 = _reference_loss_numpy(z1, z2, w, b)
    np.testing.assert_allclose(float(loss_f32), ref_f32, rtol=1e-3, atol=1e-4)

    # 2) production mode: bf16 MXU operands, f32 accumulation & softmax math.
    #    Checked against a reference that emulates the same operand rounding.
    loss_bf16 = jax.block_until_ready(simclr_loss(z1, z2, w, b, mxu_bf16=True))
    ref_bf16 = _reference_loss_numpy(z1, z2, w, b, mxu_bf16=True)
    np.testing.assert_allclose(float(loss_bf16), ref_bf16, rtol=1e-3, atol=1e-3)

    print("KERNEL_OK")
</pallas_src>

<mosaic_0001>
module attributes {stable_mosaic.version = 11 : i64} {
  func.func @_simclr_loss_kernel(%arg0: memref<2x32xf32, #tpu.memory_space<vmem>>, %arg1: memref<2x32xf32, #tpu.memory_space<vmem>>, %arg2: memref<32x32xf32, #tpu.memory_space<vmem>>, %arg3: memref<1x32xf32, #tpu.memory_space<vmem>>, %arg4: memref<1x1xf32, #tpu.memory_space<smem>>) attributes {dimension_semantics = [], scalar_prefetch = 0 : i64, scratch_operands = 0 : i64, tpu.core_type = #tpu.core_type<tc>} {
    %c0 = arith.constant 0 : index
    %c0_0 = arith.constant 0 : index
    %0 = vector.load %arg2[%c0, %c0_0] : memref<32x32xf32, #tpu.memory_space<vmem>>, vector<32x32xf32>
    %c0_1 = arith.constant 0 : index
    %c0_2 = arith.constant 0 : index
    %1 = vector.load %arg3[%c0_1, %c0_2] : memref<1x32xf32, #tpu.memory_space<vmem>>, vector<1x32xf32>
    %c0_3 = arith.constant 0 : index
    %c0_4 = arith.constant 0 : index
    %2 = vector.load %arg0[%c0_3, %c0_4] : memref<2x32xf32, #tpu.memory_space<vmem>>, vector<2x32xf32>
    %cst = arith.constant dense<0.000000e+00> : vector<2x32xf32>
    %3 = tpu.matmul %2, %0, %cst {dimension_numbers = #tpu.dot_dimension_numbers<[1], [1], [0], [0], [0, 0, 1, 0], [], []>, precision = #tpu.contract_precision<fp32>} : vector<2x32xf32>, vector<32x32xf32>, vector<2x32xf32> -> vector<2x32xf32>
    %4 = vector.broadcast %1 : vector<1x32xf32> to vector<2x32xf32>
    %5 = arith.addf %3, %4 : vector<2x32xf32>
    %6 = math.tanh %5 : vector<2x32xf32>
    %7 = arith.mulf %6, %6 : vector<2x32xf32>
    %cst_5 = arith.constant dense<0.000000e+00> : vector<2xf32>
    %8 = vector.multi_reduction <add>, %7, %cst_5 [1] : vector<2x32xf32> to vector<2xf32>
    %9 = vector.shape_cast %8 : vector<2xf32> to vector<2x1xf32>
    %cst_6 = arith.constant 1.000000e-24 : f32
    %10 = vector.broadcast %cst_6 : f32 to vector<2x1xf32>
    %11 = arith.maximumf %9, %10 : vector<2x1xf32>
    %12 = math.rsqrt %11 : vector<2x1xf32>
    %13 = vector.broadcast %12 : vector<2x1xf32> to vector<2x32xf32>
    %14 = arith.mulf %6, %13 : vector<2x32xf32>
    %c0_7 = arith.constant 0 : index
    %c0_8 = arith.constant 0 : index
    %15 = vector.load %arg1[%c0_7, %c0_8] : memref<2x32xf32, #tpu.memory_space<vmem>>, vector<2x32xf32>
    %cst_9 = arith.constant dense<0.000000e+00> : vector<2x32xf32>
    %16 = tpu.matmul %15, %0, %cst_9 {dimension_numbers = #tpu.dot_dimension_numbers<[1], [1], [0], [0], [0, 0, 1, 0], [], []>, precision = #tpu.contract_precision<fp32>} : vector<2x32xf32>, vector<32x32xf32>, vector<2x32xf32> -> vector<2x32xf32>
    %17 = vector.broadcast %1 : vector<1x32xf32> to vector<2x32xf32>
    %18 = arith.addf %16, %17 : vector<2x32xf32>
    %19 = math.tanh %18 : vector<2x32xf32>
    %20 = arith.mulf %19, %19 : vector<2x32xf32>
    %cst_10 = arith.constant dense<0.000000e+00> : vector<2xf32>
    %21 = vector.multi_reduction <add>, %20, %cst_10 [1] : vector<2x32xf32> to vector<2xf32>
    %22 = vector.shape_cast %21 : vector<2xf32> to vector<2x1xf32>
    %cst_11 = arith.constant 1.000000e-24 : f32
    %23 = vector.broadcast %cst_11 : f32 to vector<2x1xf32>
    %24 = arith.maximumf %22, %23 : vector<2x1xf32>
    %25 = math.rsqrt %24 : vector<2x1xf32>
    %26 = vector.broadcast %25 : vector<2x1xf32> to vector<2x32xf32>
    %27 = arith.mulf %19, %26 : vector<2x32xf32>
    %cst_12 = arith.constant dense<0.000000e+00> : vector<2x2xf32>
    %28 = tpu.matmul %14, %14, %cst_12 {dimension_numbers = #tpu.dot_dimension_numbers<[1], [1], [0], [0], [0, 0, 1, 0], [], []>, precision = #tpu.contract_precision<fp32>} : vector<2x32xf32>, vector<2x32xf32>, vector<2x2xf32> -> vector<2x2xf32>
    %cst_13 = arith.constant 2.000000e+01 : f32
    %29 = vector.broadcast %cst_13 : f32 to vector<2x2xf32>
    %30 = arith.mulf %28, %29 : vector<2x2xf32>
    %31 = arith.cmpf one, %30, %30 : vector<2x2xf32>
    %cst_14 = arith.constant 9.99999974E-5 : f32
    %32 = vector.broadcast %cst_14 : f32 to vector<2x2xf32>
    %33 = arith.select %31, %32, %30 : vector<2x2xi1>, vector<2x2xf32>
    %cst_15 = arith.constant dense<0.000000e+00> : vector<2x2xf32>
    %34 = tpu.matmul %14, %27, %cst_15 {dimension_numbers = #tpu.dot_dimension_numbers<[1], [1], [0], [0], [0, 0, 1, 0], [], []>, precision = #tpu.contract_precision<fp32>} : vector<2x32xf32>, vector<2x32xf32>, vector<2x2xf32> -> vector<2x2xf32>
    %cst_16 = arith.constant 2.000000e+01 : f32
    %35 = vector.broadcast %cst_16 : f32 to vector<2x2xf32>
    %36 = arith.mulf %34, %35 : vector<2x2xf32>
    %37 = arith.cmpf one, %36, %36 : vector<2x2xf32>
    %cst_17 = arith.constant 9.99999974E-5 : f32
    %38 = vector.broadcast %cst_17 : f32 to vector<2x2xf32>
    %39 = arith.select %37, %38, %36 : vector<2x2xi1>, vector<2x2xf32>
    %cst_18 = arith.constant dense<0.000000e+00> : vector<2x2xf32>
    %40 = tpu.matmul %27, %14, %cst_18 {dimension_numbers = #tpu.dot_dimension_numbers<[1], [1], [0], [0], [0, 0, 1, 0], [], []>, precision = #tpu.contract_precision<fp32>} : vector<2x32xf32>, vector<2x32xf32>, vector<2x2xf32> -> vector<2x2xf32>
    %cst_19 = arith.constant 2.000000e+01 : f32
    %41 = vector.broadcast %cst_19 : f32 to vector<2x2xf32>
    %42 = arith.mulf %40, %41 : vector<2x2xf32>
    %43 = arith.cmpf one, %42, %42 : vector<2x2xf32>
    %cst_20 = arith.constant 9.99999974E-5 : f32
    %44 = vector.broadcast %cst_20 : f32 to vector<2x2xf32>
    %45 = arith.select %43, %44, %42 : vector<2x2xi1>, vector<2x2xf32>
    %cst_21 = arith.constant dense<0.000000e+00> : vector<2x2xf32>
    %46 = tpu.matmul %27, %27, %cst_21 {dimension_numbers = #tpu.dot_dimension_numbers<[1], [1], [0], [0], [0, 0, 1, 0], [], []>, precision = #tpu.contract_precision<fp32>} : vector<2x32xf32>, vector<2x32xf32>, vector<2x2xf32> -> vector<2x2xf32>
    %cst_22 = arith.constant 2.000000e+01 : f32
    %47 = vector.broadcast %cst_22 : f32 to vector<2x2xf32>
    %48 = arith.mulf %46, %47 : vector<2x2xf32>
    %49 = arith.cmpf one, %48, %48 : vector<2x2xf32>
    %cst_23 = arith.constant 9.99999974E-5 : f32
    %50 = vector.broadcast %cst_23 : f32 to vector<2x2xf32>
    %51 = arith.select %49, %50, %48 : vector<2x2xi1>, vector<2x2xf32>
    %52 = tpu.iota {dimensions = array<i32: 0>} : vector<2x2xi32>
    %53 = tpu.iota {dimensions = array<i32: 1>} : vector<2x2xi32>
    %54 = arith.cmpi eq, %52, %53 : vector<2x2xi32>
    %cst_24 = arith.constant -1.000000e+30 : f32
    %55 = vector.broadcast %cst_24 : f32 to vector<2x2xf32>
    %56 = arith.select %54, %55, %33 : vector<2x2xi1>, vector<2x2xf32>
    %cst_25 = arith.constant -1.000000e+30 : f32
    %57 = vector.broadcast %cst_25 : f32 to vector<2x2xf32>
    %58 = arith.select %54, %57, %51 : vector<2x2xi1>, vector<2x2xf32>
    %cst_26 = arith.constant dense<0xFF800000> : vector<2xf32>
    %59 = vector.multi_reduction <maximumf>, %56, %cst_26 [1] : vector<2x2xf32> to vector<2xf32>
    %60 = vector.shape_cast %59 : vector<2xf32> to vector<2x1xf32>
    %cst_27 = arith.constant dense<0xFF800000> : vector<2xf32>
    %61 = vector.multi_reduction <maximumf>, %39, %cst_27 [1] : vector<2x2xf32> to vector<2xf32>
    %62 = vector.shape_cast %61 : vector<2xf32> to vector<2x1xf32>
    %63 = arith.maximumf %60, %62 : vector<2x1xf32>
    %64 = vector.broadcast %63 : vector<2x1xf32> to vector<2x2xf32>
    %65 = arith.subf %56, %64 : vector<2x2xf32>
    %66 = math.exp %65 : vector<2x2xf32>
    %cst_28 = arith.constant dense<0.000000e+00> : vector<2xf32>
    %67 = vector.multi_reduction <add>, %66, %cst_28 [1] : vector<2x2xf32> to vector<2xf32>
    %68 = vector.shape_cast %67 : vector<2xf32> to vector<2x1xf32>
    %69 = vector.broadcast %63 : vector<2x1xf32> to vector<2x2xf32>
    %70 = arith.subf %39, %69 : vector<2x2xf32>
    %71 = math.exp %70 : vector<2x2xf32>
    %cst_29 = arith.constant dense<0.000000e+00> : vector<2xf32>
    %72 = vector.multi_reduction <add>, %71, %cst_29 [1] : vector<2x2xf32> to vector<2xf32>
    %73 = vector.shape_cast %72 : vector<2xf32> to vector<2x1xf32>
    %74 = arith.addf %68, %73 : vector<2x1xf32>
    %75 = math.log %74 : vector<2x1xf32>
    %76 = arith.addf %63, %75 : vector<2x1xf32>
    %cst_30 = arith.constant dense<0xFF800000> : vector<2xf32>
    %77 = vector.multi_reduction <maximumf>, %45, %cst_30 [1] : vector<2x2xf32> to vector<2xf32>
    %78 = vector.shape_cast %77 : vector<2xf32> to vector<2x1xf32>
    %cst_31 = arith.constant dense<0xFF800000> : vector<2xf32>
    %79 = vector.multi_reduction <maximumf>, %58, %cst_31 [1] : vector<2x2xf32> to vector<2xf32>
    %80 = vector.shape_cast %79 : vector<2xf32> to vector<2x1xf32>
    %81 = arith.maximumf %78, %80 : vector<2x1xf32>
    %82 = vector.broadcast %81 : vector<2x1xf32> to vector<2x2xf32>
    %83 = arith.subf %45, %82 : vector<2x2xf32>
    %84 = math.exp %83 : vector<2x2xf32>
    %cst_32 = arith.constant dense<0.000000e+00> : vector<2xf32>
    %85 = vector.multi_reduction <add>, %84, %cst_32 [1] : vector<2x2xf32> to vector<2xf32>
    %86 = vector.shape_cast %85 : vector<2xf32> to vector<2x1xf32>
    %87 = vector.broadcast %81 : vector<2x1xf32> to vector<2x2xf32>
    %88 = arith.subf %58, %87 : vector<2x2xf32>
    %89 = math.exp %88 : vector<2x2xf32>
    %cst_33 = arith.constant dense<0.000000e+00> : vector<2xf32>
    %90 = vector.multi_reduction <add>, %89, %cst_33 [1] : vector<2x2xf32> to vector<2xf32>
    %91 = vector.shape_cast %90 : vector<2xf32> to vector<2x1xf32>
    %92 = arith.addf %86, %91 : vector<2x1xf32>
    %93 = math.log %92 : vector<2x1xf32>
    %94 = arith.addf %81, %93 : vector<2x1xf32>
    %95 = arith.mulf %14, %27 : vector<2x32xf32>
    %cst_34 = arith.constant dense<0.000000e+00> : vector<2xf32>
    %96 = vector.multi_reduction <add>, %95, %cst_34 [1] : vector<2x32xf32> to vector<2xf32>
    %97 = vector.shape_cast %96 : vector<2xf32> to vector<2x1xf32>
    %cst_35 = arith.constant 2.000000e+01 : f32
    %98 = vector.broadcast %cst_35 : f32 to vector<2x1xf32>
    %99 = arith.mulf %97, %98 : vector<2x1xf32>
    %100 = arith.cmpf one, %99, %99 : vector<2x1xf32>
    %cst_36 = arith.constant 9.99999974E-5 : f32
    %101 = vector.broadcast %cst_36 : f32 to vector<2x1xf32>
    %102 = arith.select %100, %101, %99 : vector<2x1xi1>, vector<2x1xf32>
    %103 = vector.extract_strided_slice %14 {offsets = [0, 0], sizes = [1, 32], strides = [1, 1]} : vector<2x32xf32> to vector<1x32xf32>
    %104 = vector.extract_strided_slice %14 {offsets = [1, 0], sizes = [1, 32], strides = [1, 1]} : vector<2x32xf32> to vector<1x32xf32>
    %105 = arith.mulf %103, %104 : vector<1x32xf32>
    %cst_37 = arith.constant dense<0.000000e+00> : vector<1xf32>
    %106 = vector.multi_reduction <add>, %105, %cst_37 [1] : vector<1x32xf32> to vector<1xf32>
    %107 = vector.shape_cast %106 : vector<1xf32> to vector<1x1xf32>
    %cst_38 = arith.constant 2.000000e+01 : f32
    %108 = vector.broadcast %cst_38 : f32 to vector<1x1xf32>
    %109 = arith.mulf %107, %108 : vector<1x1xf32>
    %110 = arith.cmpf one, %109, %109 : vector<1x1xf32>
    %cst_39 = arith.constant 9.99999974E-5 : f32
    %111 = vector.broadcast %cst_39 : f32 to vector<1x1xf32>
    %112 = arith.select %110, %111, %109 : vector<1x1xi1>, vector<1x1xf32>
    %113 = vector.shape_cast %76 : vector<2x1xf32> to vector<1x2x1xf32>
    %cst_40 = arith.constant dense<0.000000e+00> : vector<1xf32>
    %114 = vector.multi_reduction <add>, %113, %cst_40 [1, 2] : vector<1x2x1xf32> to vector<1xf32>
    %115 = vector.shape_cast %114 : vector<1xf32> to vector<1x1x1xf32>
    %116 = vector.extract %115[0, 0, 0] : f32 from vector<1x1x1xf32>
    %117 = vector.shape_cast %94 : vector<2x1xf32> to vector<1x2x1xf32>
    %cst_41 = arith.constant dense<0.000000e+00> : vector<1xf32>
    %118 = vector.multi_reduction <add>, %117, %cst_41 [1, 2] : vector<1x2x1xf32> to vector<1xf32>
    %119 = vector.shape_cast %118 : vector<1xf32> to vector<1x1x1xf32>
    %120 = vector.extract %119[0, 0, 0] : f32 from vector<1x1x1xf32>
    %121 = arith.addf %116, %120 : f32
    %122 = vector.shape_cast %102 : vector<2x1xf32> to vector<1x2x1xf32>
    %cst_42 = arith.constant dense<0.000000e+00> : vector<1xf32>
    %123 = vector.multi_reduction <add>, %122, %cst_42 [1, 2] : vector<1x2x1xf32> to vector<1xf32>
    %124 = vector.shape_cast %123 : vector<1xf32> to vector<1x1x1xf32>
    %125 = vector.extract %124[0, 0, 0] : f32 from vector<1x1x1xf32>
    %cst_43 = arith.constant 2.000000e+00 : f32
    %126 = arith.mulf %cst_43, %125 : f32
    %127 = arith.subf %121, %126 : f32
    %128 = vector.extract_strided_slice %102 {offsets = [0, 0], sizes = [1, 1], strides = [1, 1]} : vector<2x1xf32> to vector<1x1xf32>
    %129 = vector.shape_cast %128 : vector<1x1xf32> to vector<1x1x1xf32>
    %cst_44 = arith.constant dense<0.000000e+00> : vector<1xf32>
    %130 = vector.multi_reduction <add>, %129, %cst_44 [1, 2] : vector<1x1x1xf32> to vector<1xf32>
    %131 = vector.shape_cast %130 : vector<1xf32> to vector<1x1x1xf32>
    %132 = vector.extract %131[0, 0, 0] : f32 from vector<1x1x1xf32>
    %133 = arith.addf %127, %132 : f32
    %134 = vector.shape_cast %112 : vector<1x1xf32> to vector<1x1x1xf32>
    %cst_45 = arith.constant dense<0.000000e+00> : vector<1xf32>
    %135 = vector.multi_reduction <add>, %134, %cst_45 [1, 2] : vector<1x1x1xf32> to vector<1xf32>
    %136 = vector.shape_cast %135 : vector<1xf32> to vector<1x1x1xf32>
    %137 = vector.extract %136[0, 0, 0] : f32 from vector<1x1x1xf32>
    %138 = arith.subf %133, %137 : f32
    %cst_46 = arith.constant 2.500000e-01 : f32
    %139 = arith.mulf %138, %cst_46 : f32
    %c0_47 = arith.constant 0 : index
    %c0_48 = arith.constant 0 : index
    %140 = memref.load %arg4[%c0_47, %c0_48] : memref<1x1xf32, #tpu.memory_space<smem>>
    memref.store %139, %arg4[%c0_47, %c0_48] : memref<1x1xf32, #tpu.memory_space<smem>>
    return
  }
}

</mosaic_0001>

<bundles_post_ra>
// kernel: simclr_loss.1
= control target key start
LH: loop header
LB: loop body
LE: loop exit
PB: predicated region body
PF: predicated region fallthrough
CT: control target
= control target key end

     0   :  { %9 = vsyncpa [#allocation3], 0  ;;  %s1494_s0 = inlined_call_operand.hbm [shape: f32[2,32], index: 0, kind: input, shape index: {}]   ;;  %s1495_s1 = inlined_call_operand.hbm [shape: f32[2,32], index: 1, kind: input, shape index: {}]   ;;  %s1496_s2 = inlined_call_operand.hbm [shape: f32[32,32], index: 2, kind: input, shape index: {}]   ;;  %s1497_s3 = inlined_call_operand.vmem [shape: f32[1,32], index: 3, kind: input, shape index: {}]   ;;  %s1498_s4 = inlined_call_operand.hbm [shape: f32[1,1], index: 4, kind: output, shape index: {}]  }
   0x1   :  { %10 = vsyncpa [#allocation6], 0  ;;  %s28_s17 = sshll.u32 %s1495_s1, 4  ;;  %s29_s17 = int_to_ptr.hbm [resolvable:$true] %s28_s17 }
   0x2   :  { %11 = vsyncpa [#allocation4], 0  ;;  %s1355_s18 = smov [#allocation5]   ;;  %s17_s22 = sshll.u32 %s1494_s0, 4  ;;  %s18_s22 = int_to_ptr.hbm [resolvable:$true] %s17_s22 }
   0x3   :  { %s30_s19 = sshll.u32 %s1355_s18, 4  ;;  %s1356_s23 = smov [#allocation2]   ;;  %s31_s19 = int_to_ptr.vmem [resolvable:$true] %s30_s19 }
   0x4   :  { %33 = dma.hbm_to_vmem [thread:$0]  %s29_s17, 32, %s31_s19, [#allocation6]  }
   0x5   :  { %s19_s24 = sshll.u32 %s1356_s23, 4  ;;  %s38_s27 = sshll.u32 %s1496_s2, 4  ;;  %s20_s24 = int_to_ptr.vmem [resolvable:$true] %s19_s24  ;;  %s39_s27 = int_to_ptr.hbm [resolvable:$true] %s38_s27 }
   0x6   :  { %22 = dma.hbm_to_vmem [thread:$0]  %s18_s22, 32, %s20_s24, [#allocation3]  }
   0x7   :  { %s1357_s1 = smov [#allocation7]   ;;  %s1358_s29 = smov 128  }
   0x8   :  { %s40_s28 = sshll.u32 %s1357_s1, 4  ;;  %s1359_s30 = smov 8   ;;  %s41_s28 = int_to_ptr.vmem [resolvable:$true] %s40_s28 }
   0x9   :  { %46 = dma.hbm_to_vmem [thread:$0]  %s39_s27, 512, %s41_s28, [#allocation6], %s1358_s29, %s1358_s29, %s1359_s30  }
   0xa   :  { %1349 = dma.done.wait [#allocation3], 32  }
   0xb   :  { %1350 = vsyncadd [#allocation3], 4294967264 }
   0xc   :  { %1351 = dma.done.wait [#allocation6], 544  }
   0xd   :  { %1352 = vsyncadd [#allocation6], 4294966752  ;;  %vm70_vm0 = vcmask 261120   ;;  %v64_v0 = vld [vmem:[#allocation7 + $0x18] sm:$0xff]  ;;  %v63_v1 = vld [vmem:[#allocation7 + $0x10] sm:$0xff]  ;;  %vm273_vm1 = vcmask 254976  }
   0xe   :  { %v62_v2 = vld [vmem:[#allocation7 + $0x8] sm:$0xff]  ;;  %v84_v3 = vsel %vm70_vm0, %v64_v0, 0  ;;  %v81_v4 = vsel %vm70_vm0, %v63_v1, 0  ;;  %v61_v6 = vld [vmem:[#allocation7] sm:$0xff]  ;;  %v66_v7 = vld [vmem:[#allocation2] sm:$0x3] }
   0xf   :  { %v78_v5 = vsel %vm70_vm0, %v62_v2, 0  ;;  %v1398_v8 = vand.u32 4294901760, %v84_v3  ;;  %v1400_v9 = vand.u32 4294901760, %v81_v4  ;;  %v75_v11 = vsel %vm70_vm0, %v61_v6, 0  ;;  %v289_v26 = vld [vmem:[#allocation5] sm:$0x3] }
  0x10   :  { %v1402_v10 = vand.u32 4294901760, %v78_v5  ;;  %v1405_v12 = vand.u32 4294901760, %v75_v11  ;;  %v72_v13 = vsel %vm70_vm0, %v66_v7, 0  ;;  %v291_v29 = vsel %vm70_vm0, %v289_v26, 0  ;;  %v1244_v42 = vld [vmem:[%s1497_s3] ss:$0 sm:$0xff] }
  0x11   :  { %v128_v14 = vsub.f32 %v84_v3, %v1398_v8  ;;  %99 = vmatpush.xpose.msra.mxu0 %v1398_v8  ;;  %199 = vmatpush.xpose.msra.mxu3 %v1398_v8  ;;  %v1412_v15 = vsub.f32 %v81_v4, %v1400_v9  ;;  %v1417_v17 = vand.u32 4294901760, %v72_v13  ;;  %v313_v33 = vand.u32 4294901760, %v291_v29  ;;  %s1216_s15 = sshll.u32 %s1498_s4, 4  ;;  %s1360_s18 = smov [#allocation8]   ;;  %s1217_s15 = int_to_ptr.hbm [resolvable:$true] %s1216_s15 }
  0x12   :  { %v1415_v16 = vsub.f32 %v78_v5, %v1402_v10  ;;  %v1422_v21 = vsub.f32 %v75_v11, %v1405_v12  ;;  %vm1104_vm10 = vcmask 9216   ;;  %vm1168_vm14 = vcmask 1024  }
  0x13   :  { %170 = vmatpush.xpose.msra.mxu2 %v128_v14  ;;  %v129_v18 = vand.u32 4294901760, %v128_v14  ;;  %v135_v19 = vand.u32 4294901760, %v1412_v15  ;;  %v107_v20 = vsub.f32 %v72_v13, %v1417_v17  ;;  %v314_v37 = vsub.f32 %v291_v29, %v313_v33 }
  0x14   :  { %v141_v24 = vand.u32 4294901760, %v1415_v16  ;;  %v147_v32 = vand.u32 4294901760, %v1422_v21 }
  0x15   :  { %v130_v22 = vsub.f32 %v128_v14, %v129_v18  ;;  %101 = vmatpush.xpose.msra.mxu0 %v1400_v9  ;;  %201 = vmatpush.xpose.msra.mxu3 %v1400_v9  ;;  %v136_v23 = vsub.f32 %v1412_v15, %v135_v19  ;;  %v108_v25 = vand.u32 4294901760, %v107_v20  ;;  %v315_v39 = vand.u32 4294901760, %v314_v37 }
  0x16   :  { %v142_v31 = vsub.f32 %v1415_v16, %v141_v24  ;;  %v148_v36 = vsub.f32 %v1422_v21, %v147_v32 }
  0x17   :  { %v131_v27 = vand.u32 4294901760, %v130_v22  ;;  %173 = vmatpush.xpose.msra.mxu2 %v1412_v15  ;;  %v109_v28 = vsub.f32 %v107_v20, %v108_v25  ;;  %v137_v30 = vand.u32 4294901760, %v136_v23  ;;  %v316_v40 = vsub.f32 %v314_v37, %v315_v39 }
  0x18   :  { %v143_v35 = vand.u32 4294901760, %v142_v31  ;;  %v149_v38 = vand.u32 4294901760, %v148_v36 }
  0x19   :  { %132 = vmatpush.xpose.msra.mxu1 %v131_v27  ;;  %103 = vmatpush.xpose.msra.mxu0 %v1402_v10  ;;  %v110_v34 = vand.u32 4294901760, %v109_v28  ;;  %v317_v41 = vand.u32 4294901760, %v316_v40 }
  0x1a   :  { %203 = vmatpush.xpose.msra.mxu3 %v1402_v10 }
  0x1b   :  { %176 = vmatpush.xpose.msra.mxu2 %v1415_v16 }
  0x1d   :  { %138 = vmatpush.xpose.msra.mxu1 %v137_v30  ;;  %105 = vmatpush.xpose.msra.mxu0 %v1405_v12 }
  0x1e   :  { %205 = vmatpush.xpose.msra.mxu3 %v1405_v12 }
  0x1f   :  { %179 = vmatpush.xpose.msra.mxu2 %v1422_v21 }
  0x20   :  { %111 = vmatmul.f32.vlgmr.msra.gmra.mxu0 %v110_v34 }
  0x21   :  { %228 = vmatpush.xpose.msrb.mxu0 %v129_v18  ;;  %144 = vmatpush.xpose.msra.mxu1 %v143_v35 }
  0x22   :  { %339 = vmatpush.xpose.msrb.mxu3 %v131_v27  ;;  %182 = vmatmul.f32.vlgmr.msra.gmra.mxu2 %v107_v20 }
  0x23   :  { %306 = vmatpush.xpose.msrb.mxu2 %v1398_v8  ;;  %209 = vmatmul.f32.vlgmr.msra.gmra.mxu3 %v108_v25 }
  0x25   :  { %232 = vmatpush.xpose.msrb.mxu0 %v135_v19  ;;  %150 = vmatpush.xpose.msra.mxu1 %v149_v38 }
  0x26   :  { %345 = vmatpush.xpose.msrb.mxu3 %v137_v30 }
  0x27   :  { %308 = vmatpush.xpose.msrb.mxu2 %v1400_v9 }
  0x28   :  { %152 = vmatmul.f32.vlgmr.msra.gmra.mxu1 %v1417_v17 }
  0x29   :  { %259 = vmatpush.xpose.msrb.mxu1 %v1398_v8  ;;  %236 = vmatpush.xpose.msrb.mxu0 %v141_v24 }
  0x2a   :  { %351 = vmatpush.xpose.msrb.mxu3 %v143_v35 }
  0x2b   :  { %310 = vmatpush.xpose.msrb.mxu2 %v1402_v10 }
  0x2d   :  { %261 = vmatpush.xpose.msrb.mxu1 %v1400_v9  ;;  %240 = vmatpush.xpose.msrb.mxu0 %v147_v32 }
  0x2e   :  { %357 = vmatpush.xpose.msrb.mxu3 %v149_v38 }
  0x2f   :  { %312 = vmatpush.xpose.msrb.mxu2 %v1405_v12 }
  0x30   :  { %242 = vmatmul.f32.vlgmr.msrb.gmra.mxu0 %v1417_v17 }
  0x31   :  { %377 = vmatpush.xpose.msra.mxu0 %v128_v14  ;;  %263 = vmatpush.xpose.msrb.mxu1 %v1402_v10 }
  0x32   :  { %466 = vmatpush.xpose.msra.mxu3 %v1398_v8  ;;  %318 = vmatmul.f32.vlgmr.msrb.gmra.mxu2 %v317_v41 }
  0x33   :  { %435 = vmatpush.xpose.msra.mxu2 %v129_v18  ;;  %359 = vmatmul.f32.vlgmr.msrb.gmra.mxu3 %v313_v33 }
  0x35   :  { %380 = vmatpush.xpose.msra.mxu0 %v1412_v15  ;;  %265 = vmatpush.xpose.msrb.mxu1 %v1405_v12 }
  0x36   :  { %468 = vmatpush.xpose.msra.mxu3 %v1400_v9 }
  0x37   :  { %439 = vmatpush.xpose.msra.mxu2 %v135_v19 }
  0x38   :  { %267 = vmatmul.f32.vlgmr.msrb.gmra.mxu1 %v1417_v17 }
  0x39   :  { %406 = vmatpush.xpose.msra.mxu1 %v1398_v8  ;;  %383 = vmatpush.xpose.msra.mxu0 %v1415_v16 }
  0x3a   :  { %470 = vmatpush.xpose.msra.mxu3 %v1402_v10 }
  0x3b   :  { %443 = vmatpush.xpose.msra.mxu2 %v141_v24 }
  0x3d   :  { %408 = vmatpush.xpose.msra.mxu1 %v1400_v9  ;;  %386 = vmatpush.xpose.msra.mxu0 %v1422_v21 }
  0x3e   :  { %472 = vmatpush.xpose.msra.mxu3 %v1405_v12 }
  0x3f   :  { %447 = vmatpush.xpose.msra.mxu2 %v147_v32 }
  0x40   :  { %389 = vmatmul.f32.vlgmr.msra.gmra.mxu0 %v314_v37 }
  0x41   :  { %410 = vmatpush.xpose.msra.mxu1 %v1402_v10  ;;  %474 = vmatmul.f32.vlgmr.msra.gmra.mxu3 %v313_v33 }
  0x42   :  { %449 = vmatmul.f32.vlgmr.msra.gmra.mxu2 %v313_v33 }
  0x45   :  { %412 = vmatpush.xpose.msra.mxu1 %v1405_v12 }
  0x48   :  { %416 = vmatmul.f32.vlgmr.msra.gmra.mxu1 %v315_v39 }
  0x9d   :  { %v112_v43 = vpop.f32.mrf.mxu0 }
  0x9e   :  { %v113_v44 = vadd.f32 %v1244_v42, %v112_v43 }
  0xa5   :  { %v153_v45 = vpop.f32.mrf.mxu1  ;;  %v183_v46 = vpop.f32.mrf.mxu2 }
  0xa6   :  { %v154_v47 = vadd.f32 %v153_v45, %v113_v44  ;;  %v210_v49 = vpop.f32.mrf.mxu3 }
  0xa8   :  { %v184_v48 = vadd.f32 %v183_v46, %v154_v47 }
  0xaa   :  { %v211_v50 = vadd.f32 %v210_v49, %v184_v48  ;;  %v1097_v48 = vlaneseq }
  0xad   :  { %v243_v51 = vpop.f32.mrf.mxu0 }
  0xae   :  { %v244_v52 = vadd.f32 %v243_v51, %v211_v50 }
  0xb5   :  { %v268_v53 = vpop.f32.mrf.mxu1  ;;  %v319_v54 = vpop.f32.mrf.mxu2 }
  0xb6   :  { %v269_v55 = vadd.f32 %v268_v53, %v244_v52  ;;  %v320_v56 = vadd.f32 %v1244_v42, %v319_v54  ;;  %v360_v57 = vpop.f32.mrf.mxu3  ;;  %v1098_v53 = vshrl.u32 %v1097_v48, 7  ;;  %v1100_v54 = vand.u32 127, %v1097_v48 }
  0xb8   :  { %1245 = vtanh.f32 %v269_v55  ;;  %v361_v58 = vadd.f32 %v360_v57, %v320_v56  ;;  %vm1101_vm8 = vcmp.eq.s32.totalorder %v1098_v53, %v1100_v54 }
  0xbd   :  { %v390_v59 = vpop.f32.mrf.mxu0 }
  0xbe   :  { %v1246_v60 = vpop.eup %1245  ;;  %v391_v61 = vadd.f32 %v390_v59, %v361_v58 }
  0xbf   :  { %v272_v62 = vmul.f32 %v1246_v60, %v1246_v60 }
  0xc1   :  { %v274_v63 = vsel %vm273_vm1, %v272_v62, 0.0 }
  0xc2   :  { %275 = vadd.xlane.f32.xlu0 %v274_v63 }
  0xc4   :  { %v475_v3 = vpop.f32.mrf.mxu3 }
  0xc5   :  { %v417_v0 = vpop.f32.mrf.mxu1  ;;  %v450_v1 = vpop.f32.mrf.mxu2 }
  0xc6   :  { %v418_v2 = vadd.f32 %v417_v0, %v391_v61 }
  0xc8   :  { %v451_v4 = vadd.f32 %v450_v1, %v418_v2 }
  0xca   :  { %v476_v5 = vadd.f32 %v475_v3, %v451_v4 }
  0xcc   :  { %1247 = vtanh.f32 %v476_v5 }
  0xd2   :  { %v1248_v6 = vpop.eup %1247 }
  0xd3   :  { %v479_v7 = vmul.f32 %v1248_v6, %v1248_v6 }
  0xd5   :  { %v480_v8 = vsel %vm273_vm1, %v479_v7, 0.0 }
  0xd6   :  { %481 = vadd.xlane.f32.xlu0 %v480_v8 }
 0x135   :  { %v276_v9 = vpop.xlane.xlu0 %275 }
 0x136   :  { %v277_v10 = vmax.f32 %v276_v9, 1e-24 }
 0x138   :  { %1249 = vrsqrt.f32 %v277_v10  ;;  %vm284_vm3 = vweird.f32 %v277_v10 }
 0x13e   :  { %v1250_v11 = vpop.eup %1249 }
 0x13f   :  { %v279_v12 = vmul.f32 %v1250_v11, %v277_v10  ;;  %vm285_vm2 = vweird.f32 %v1250_v11 }
 0x140   :  { %vm286_vm4 = vmor %vm284_vm3, %vm285_vm2 }
 0x141   :  { %v280_v13 = vmul.f32 %v1250_v11, %v279_v12 }
 0x143   :  { %v281_v14 = vmul.f32 0.5, %v280_v13 }
 0x145   :  { %v282_v15 = vsub.f32 1.5, %v281_v14 }
 0x147   :  { %v283_v17 = vmul.f32 %v1250_v11, %v282_v15 }
 0x149   :  { %v482_v16 = vpop.xlane.xlu0 %481  ;;  %v287_v19 = vsel %vm286_vm4, %v1250_v11, %v283_v17 }
 0x14a   :  { %v483_v18 = vmax.f32 %v482_v16, 1e-24  ;;  %v1466_v20 = vmul.f32 %v1246_v60, %v287_v19 }
 0x14c   :  { %1251 = vrsqrt.f32 %v483_v18  ;;  %v496_v21 = vsel %vm70_vm0, %v1466_v20, 0  ;;  %vm490_vm6 = vweird.f32 %v483_v18 }
 0x14d   :  { %v513_v22 = vand.u32 4294901760, %v496_v21 }
 0x14f   :  { %514 = vmatpush.xpose.msrb.mxu0 %v513_v22  ;;  %590 = vmatpush.xpose.msrb.mxu3 %v513_v22  ;;  %v516_v24 = vsub.f32 %v496_v21, %v513_v22 }
 0x151   :  { %567 = vmatpush.xpose.msrb.mxu2 %v516_v24  ;;  %v517_v26 = vand.u32 4294901760, %v516_v24 }
 0x152   :  { %v1252_v23 = vpop.eup %1251 }
 0x153   :  { %v485_v25 = vmul.f32 %v1252_v23, %v483_v18  ;;  %594 = vmatmul.f32.vlgmr.msrb.gmra.mxu3 %v517_v26  ;;  %616 = vmatpush.xpose.msra.mxu0 %v517_v26  ;;  %v518_v28 = vsub.f32 %v516_v24, %v517_v26  ;;  %vm491_vm5 = vweird.f32 %v1252_v23 }
 0x154   :  { %570 = vmatmul.f32.vlgmr.msrb.gmra.mxu2 %v516_v24  ;;  %vm492_vm7 = vmor %vm490_vm6, %vm491_vm5 }
 0x155   :  { %v486_v27 = vmul.f32 %v1252_v23, %v485_v25  ;;  %v519_v30 = vand.u32 4294901760, %v518_v28 }
 0x157   :  { %v487_v29 = vmul.f32 0.5, %v486_v27  ;;  %520 = vmatmul.f32.vlgmr.msrb.gmra.mxu0 %v519_v30  ;;  %544 = vmatpush.xpose.msrb.mxu1 %v519_v30 }
 0x159   :  { %v488_v31 = vsub.f32 1.5, %v487_v29 }
 0x15a   :  { %546 = vmatmul.f32.vlgmr.msrb.gmra.mxu1 %v513_v22 }
 0x15b   :  { %v489_v32 = vmul.f32 %v1252_v23, %v488_v31  ;;  %638 = vmatpush.xpose.msra.mxu1 %v513_v22 }
 0x15d   :  { %v493_v33 = vsel %vm492_vm7, %v1252_v23, %v489_v32 }
 0x15e   :  { %v494_v34 = vmul.f32 %v1248_v6, %v493_v33 }
 0x15f   :  { %618 = vmatmul.f32.vlgmr.msra.gmra.mxu0 %v513_v22 }
 0x160   :  { %v648_v35 = vsel %vm70_vm0, %v494_v34, 0  ;;  %v1472_v36 = vmul.f32 %v494_v34, %v1466_v20  ;;  %vm1161_vm0 = vcmask 253952  }
 0x161   :  { %v665_v37 = vand.u32 4294901760, %v648_v35 }
 0x162   :  { %640 = vmatmul.f32.vlgmr.msra.gmra.mxu1 %v513_v22  ;;  %v1152_v53 = vsel %vm273_vm1, %v1472_v36, 0.0 }
 0x163   :  { %v692_v38 = vsub.f32 %v648_v35, %v665_v37  ;;  %666 = vmatpush.xpose.msra.mxu2 %v665_v37  ;;  %742 = vmatpush.xpose.msrb.mxu1 %v665_v37 }
 0x165   :  { %719 = vmatpush.xpose.msrb.mxu0 %v692_v38  ;;  %v693_v39 = vand.u32 4294901760, %v692_v38 }
 0x166   :  { %672 = vmatmul.f32.vlgmr.msra.gmra.mxu2 %v519_v30 }
 0x167   :  { %845 = vmatpush.xpose.msra.mxu1 %v519_v30  ;;  %768 = vmatpush.xpose.msrb.mxu2 %v693_v39  ;;  %v694_v40 = vsub.f32 %v692_v38, %v693_v39 }
 0x168   :  { %722 = vmatmul.f32.vlgmr.msrb.gmra.mxu0 %v516_v24 }
 0x169   :  { %815 = vmatpush.xpose.msra.mxu0 %v513_v22  ;;  %v695_v41 = vand.u32 4294901760, %v694_v40 }
 0x16a   :  { %746 = vmatmul.f32.vlgmr.msrb.gmra.mxu1 %v517_v26 }
 0x16b   :  { %868 = vmatpush.xpose.msra.mxu2 %v516_v24  ;;  %696 = vmatpush.xpose.msra.mxu3 %v695_v41 }
 0x16c   :  { %939 = vmatpush.xpose.msrb.mxu1 %v513_v22 }
 0x16d   :  { %917 = vmatpush.xpose.msrb.mxu0 %v517_v26 }
 0x16e   :  { %698 = vmatmul.f32.vlgmr.msra.gmra.mxu3 %v513_v22  ;;  %770 = vmatmul.f32.vlgmr.msrb.gmra.mxu2 %v513_v22 }
 0x16f   :  { %790 = vmatpush.xpose.msrb.mxu3 %v665_v37  ;;  %964 = vmatpush.xpose.msrb.mxu2 %v665_v37 }
 0x170   :  { %821 = vmatmul.f32.vlgmr.msra.gmra.mxu0 %v695_v41 }
 0x171   :  { %1017 = vmatpush.xpose.msra.mxu0 %v692_v38 }
 0x172   :  { %847 = vmatmul.f32.vlgmr.msra.gmra.mxu1 %v665_v37 }
 0x173   :  { %891 = vmatpush.xpose.msra.mxu3 %v513_v22  ;;  %1040 = vmatpush.xpose.msra.mxu1 %v665_v37 }
 0x176   :  { %792 = vmatmul.f32.vlgmr.msrb.gmra.mxu3 %v513_v22  ;;  %871 = vmatmul.f32.vlgmr.msra.gmra.mxu2 %v692_v38 }
 0x177   :  { %994 = vmatpush.xpose.msrb.mxu3 %v695_v41  ;;  %1066 = vmatpush.xpose.msra.mxu2 %v693_v39 }
 0x178   :  { %919 = vmatmul.f32.vlgmr.msrb.gmra.mxu0 %v665_v37 }
 0x17a   :  { %941 = vmatmul.f32.vlgmr.msrb.gmra.mxu1 %v665_v37 }
 0x17e   :  { %895 = vmatmul.f32.vlgmr.msra.gmra.mxu3 %v693_v39  ;;  %970 = vmatmul.f32.vlgmr.msrb.gmra.mxu2 %v695_v41 }
 0x17f   :  { %1088 = vmatpush.xpose.msra.mxu3 %v665_v37 }
 0x180   :  { %1020 = vmatmul.f32.vlgmr.msra.gmra.mxu0 %v692_v38 }
 0x182   :  { %1044 = vmatmul.f32.vlgmr.msra.gmra.mxu1 %v693_v39 }
 0x186   :  { %996 = vmatmul.f32.vlgmr.msrb.gmra.mxu3 %v665_v37  ;;  %1068 = vmatmul.f32.vlgmr.msra.gmra.mxu2 %v665_v37 }
 0x18e   :  { %1090 = vmatmul.f32.vlgmr.msra.gmra.mxu3 %v665_v37 }
 0x1d4   :  { %v521_v42 = vpop.f32.mrf.mxu0 }
 0x1d6   :  { %v595_v47 = vpop.f32.mrf.mxu3 }
 0x1d7   :  { %v547_v43 = vpop.f32.mrf.mxu1  ;;  %v571_v45 = vpop.f32.mrf.mxu2 }
 0x1d8   :  { %v548_v44 = vadd.f32 %v547_v43, %v521_v42 }
 0x1da   :  { %v572_v46 = vadd.f32 %v571_v45, %v548_v44 }
 0x1dc   :  { %v596_v49 = vadd.f32 %v595_v47, %v572_v46  ;;  %v619_v50 = vpop.f32.mrf.mxu0 }
 0x1de   :  { %v620_v51 = vadd.f32 %v619_v50, %v596_v49 }
 0x1df   :  { %v641_v52 = vpop.f32.mrf.mxu1 }
 0x1e0   :  { %v642_v55 = vadd.f32 %v641_v52, %v620_v51 }
 0x1e2   :  { %v644_v56 = vmul.f32 20.0, %v642_v55 }
 0x1e4   :  { %vm645_vm9 = vcmp.ne.f32.partialorder %v644_v56, %v644_v56 }
 0x1e5   :  { %v646_v57 = vsel %vm645_vm9, 0.0001, %v644_v56  ;;  %v723_v61 = vpop.f32.mrf.mxu0 }
 0x1e6   :  { %v1102_v59 = vsel %vm1101_vm8, -1e+30, %v646_v57 }
 0x1e7   :  { %v1105_v60 = vsel %vm1104_vm10, %v1102_v59, -inf  ;;  %v747_v62 = vpop.f32.mrf.mxu1 }
 0x1e8   :  { %1106 = vmax.xlane.f32.xlu1 %v1105_v60 }
 0x1e9   :  { %v673_v58 = vpop.f32.mrf.mxu2 }
 0x1ed   :  { %v822_v4 = vpop.f32.mrf.mxu0 }
 0x1ef   :  { %v848_v6 = vpop.f32.mrf.mxu1 }
 0x1f0   :  { %v849_v11 = vadd.f32 %v848_v6, %v822_v4 }
 0x1f1   :  { %v699_v63 = vpop.f32.mrf.mxu3  ;;  %v771_v1 = vpop.f32.mrf.mxu2 }
 0x1f2   :  { %v700_v0 = vadd.f32 %v699_v63, %v673_v58 }
 0x1f4   :  { %v724_v2 = vadd.f32 %v723_v61, %v700_v0 }
 0x1f5   :  { %v920_v15 = vpop.f32.mrf.mxu0 }
 0x1f6   :  { %v748_v3 = vadd.f32 %v747_v62, %v724_v2 }
 0x1f7   :  { %v942_v18 = vpop.f32.mrf.mxu1 }
 0x1f8   :  { %v772_v5 = vadd.f32 %v771_v1, %v748_v3 }
 0x1f9   :  { %v793_v7 = vpop.f32.mrf.mxu3  ;;  %v872_v9 = vpop.f32.mrf.mxu2 }
 0x1fa   :  { %v794_v8 = vadd.f32 %v793_v7, %v772_v5  ;;  %v873_v13 = vadd.f32 %v872_v9, %v849_v11 }
 0x1fc   :  { %v796_v10 = vmul.f32 20.0, %v794_v8 }
 0x1fd   :  { %v1021_v26 = vpop.f32.mrf.mxu0 }
 0x1fe   :  { %vm797_vm11 = vcmp.ne.f32.partialorder %v796_v10, %v796_v10 }
 0x1ff   :  { %v798_v12 = vsel %vm797_vm11, 0.0001, %v796_v10  ;;  %v1045_v30 = vpop.f32.mrf.mxu1  ;;  %v1158_v10 = vrot.slane %v1466_v20, 1 }
 0x200   :  { %v1108_v14 = vsel %vm1104_vm10, %v798_v12, -inf }
 0x201   :  { %v896_v16 = vpop.f32.mrf.mxu3  ;;  %1109 = vmax.xlane.f32.xlu1 %v1108_v14  ;;  %v971_v21 = vpop.f32.mrf.mxu2  ;;  %v1160_v11 = vmul.f32 %v1158_v10, %v1466_v20 }
 0x202   :  { %v897_v17 = vadd.f32 %v896_v16, %v873_v13 }
 0x204   :  { %v921_v19 = vadd.f32 %v920_v15, %v897_v17 }
 0x206   :  { %v943_v22 = vadd.f32 %v942_v18, %v921_v19 }
 0x208   :  { %v945_v23 = vmul.f32 20.0, %v943_v22 }
 0x209   :  { %v997_v24 = vpop.f32.mrf.mxu3  ;;  %v1069_v32 = vpop.f32.mrf.mxu2 }
 0x20a   :  { %v998_v25 = vadd.f32 %v997_v24, %v971_v21  ;;  %vm946_vm12 = vcmp.ne.f32.partialorder %v945_v23, %v945_v23 }
 0x20b   :  { %v947_v27 = vsel %vm946_vm12, 0.0001, %v945_v23 }
 0x20c   :  { %v1022_v28 = vadd.f32 %v1021_v26, %v998_v25  ;;  %v1128_v29 = vsel %vm1104_vm10, %v947_v27, -inf }
 0x20d   :  { %1129 = vmax.xlane.f32.xlu2 %v1128_v29 }
 0x20e   :  { %v1046_v31 = vadd.f32 %v1045_v30, %v1022_v28 }
 0x210   :  { %v1070_v33 = vadd.f32 %v1069_v32, %v1046_v31 }
 0x211   :  { %v1091_v34 = vpop.f32.mrf.mxu3 }
 0x212   :  { %v1092_v35 = vadd.f32 %v1091_v34, %v1070_v33 }
 0x214   :  { %v1094_v37 = vmul.f32 20.0, %v1092_v35 }
 0x216   :  { %vm1095_vm13 = vcmp.ne.f32.partialorder %v1094_v37, %v1094_v37 }
 0x217   :  { %v1096_v38 = vsel %vm1095_vm13, 0.0001, %v1094_v37 }
 0x218   :  { %v1103_v39 = vsel %vm1101_vm8, -1e+30, %v1096_v38 }
 0x219   :  { %v1131_v40 = vsel %vm1104_vm10, %v1103_v39, -inf }
 0x21a   :  { %1132 = vmax.xlane.f32.xlu2 %v1131_v40 }
 0x25b   :  { %v1107_v41 = vpop.xlane.xlu1 %1106 }
 0x274   :  { %v1110_v42 = vpop.xlane.xlu1 %1109 }
 0x275   :  { %v1111_v43 = vmax.f32 %v1107_v41, %v1110_v42 }
 0x277   :  { %v1112_v44 = vsub.f32 %v1102_v59, %v1111_v43  ;;  %v1118_v45 = vsub.f32 %v798_v12, %v1111_v43  ;;  %v1162_v12 = vsel %vm1161_vm0, %v1160_v11, 0.0 }
 0x279   :  { %v1113_v46 = vmul.f32 1.442695, %v1112_v44  ;;  %v1119_v47 = vmul.f32 1.442695, %v1118_v45 }
 0x27b   :  { %1253 = vpow2.f32 %v1113_v46 }
 0x27c   :  { %1255 = vpow2.f32 %v1119_v47 }
 0x280   :  { %v1130_v52 = vpop.xlane.xlu2 %1129 }
 0x281   :  { %v1254_v48 = vpop.eup %1253 }
 0x282   :  { %v1256_v49 = vpop.eup %1255  ;;  %v1115_v50 = vsel %vm1104_vm10, %v1254_v48, 0.0 }
 0x283   :  { %v1121_v51 = vsel %vm1104_vm10, %v1256_v49, 0.0  ;;  %1116 = vadd.xlane.f32.xlu0 %v1115_v50 }
 0x284   :  { %1122 = vadd.xlane.f32.xlu1 %v1121_v51 }
 0x28c   :  { %1153 = vadd.xlane.f32.xlu1 %v1152_v53 }
 0x28d   :  { %v1133_v54 = vpop.xlane.xlu2 %1132 }
 0x28e   :  { %v1134_v55 = vmax.f32 %v1130_v52, %v1133_v54 }
 0x290   :  { %v1135_v56 = vsub.f32 %v947_v27, %v1134_v55  ;;  %v1141_v57 = vsub.f32 %v1103_v39, %v1134_v55 }
 0x292   :  { %v1136_v58 = vmul.f32 1.442695, %v1135_v56  ;;  %v1142_v59 = vmul.f32 1.442695, %v1141_v57 }
 0x294   :  { %1257 = vpow2.f32 %v1136_v58 }
 0x295   :  { %1259 = vpow2.f32 %v1142_v59 }
 0x29a   :  { %v1258_v60 = vpop.eup %1257 }
 0x29b   :  { %v1260_v61 = vpop.eup %1259  ;;  %v1138_v62 = vsel %vm1104_vm10, %v1258_v60, 0.0 }
 0x29c   :  { %1139 = vadd.xlane.f32.xlu2 %v1138_v62  ;;  %v1144_v63 = vsel %vm1104_vm10, %v1260_v61, 0.0 }
 0x29d   :  { %1145 = vadd.xlane.f32.xlu0 %v1144_v63 }
 0x2f6   :  { %v1117_v0 = vpop.xlane.xlu0 %1116 }
 0x2f7   :  { %v1123_v1 = vpop.xlane.xlu1 %1122 }
 0x2f8   :  { %v1124_v36 = vadd.f32 %v1123_v1, %v1117_v0 }
 0x2fa   :  { %1261 = vlog2.f32 %v1124_v36 }
 0x2ff   :  { %v1154_v2 = vpop.xlane.xlu1 %1153 }
 0x300   :  { %v1262_v3 = vpop.eup %1261  ;;  %v1155_v4 = vmul.f32 20.0, %v1154_v2 }
 0x301   :  { %v1126_v5 = vmul.f32 0.6931472, %v1262_v3 }
 0x302   :  { %vm1156_vm15 = vcmp.ne.f32.partialorder %v1155_v4, %v1155_v4 }
 0x303   :  { %v1157_v6 = vsel %vm1156_vm15, 0.0001, %v1155_v4  ;;  %v1127_v7 = vadd.f32 %v1126_v5, %v1111_v43 }
 0x304   :  { %v1190_v8 = vsel %vm1168_vm14, %v1157_v6, 0.0 }
 0x305   :  { %1191 = vadd.xlane.f32.xlu1 %v1190_v8  ;;  %v1169_v9 = vsel %vm1168_vm14, %v1127_v7, 0.0 }
 0x306   :  { %1170 = vadd.xlane.f32.xlu2 %v1169_v9 }
 0x30e   :  { %1163 = vadd.xlane.f32.xlu2 %v1162_v12 }
 0x30f   :  { %v1140_v13 = vpop.xlane.xlu2 %1139 }
 0x310   :  { %v1146_v14 = vpop.xlane.xlu0 %1145 }
 0x311   :  { %v1147_v15 = vadd.f32 %v1146_v14, %v1140_v13 }
 0x313   :  { %1263 = vlog2.f32 %v1147_v15 }
 0x319   :  { %v1264_v16 = vpop.eup %1263 }
 0x31a   :  { %v1149_v17 = vmul.f32 0.6931472, %v1264_v16 }
 0x31c   :  { %v1150_v18 = vadd.f32 %v1149_v17, %v1134_v55 }
 0x31e   :  { %v1179_v19 = vsel %vm1168_vm14, %v1150_v18, 0.0 }
 0x31f   :  { %1180 = vadd.xlane.f32.xlu0 %v1179_v19 }
 0x378   :  { %v1192_v27 = vpop.xlane.xlu1 %1191 }
 0x379   :  { %v1171_v21 = vpop.xlane.xlu2 %1170  ;;  %v1193_v28 = vrot.slane %v1192_v27, 4 }
 0x37a   :  { %v1172_v22 = vrot.slane %v1171_v21, 4 }
 0x37b   :  { %v1194_v29 = vadd.f32 %v1193_v28, %v1192_v27 }
 0x37c   :  { %v1173_v23 = vadd.f32 %v1172_v22, %v1171_v21 }
 0x37d   :  { %v1195_v30 = vrot.slane %v1194_v29, 2 }
 0x37e   :  { %v1174_v24 = vrot.slane %v1173_v23, 2 }
 0x37f   :  { %v1196_v34 = vadd.f32 %v1195_v30, %v1194_v29 }
 0x380   :  { %v1175_v25 = vadd.f32 %v1174_v24, %v1173_v23 }
 0x381   :  { %v1164_v35 = vpop.xlane.xlu2 %1163  ;;  %v1197_v40 = vrot.slane %v1196_v34, 1 }
 0x382   :  { %v1176_v26 = vrot.slane %v1175_v25, 1  ;;  %v1165_v39 = vmul.f32 20.0, %v1164_v35 }
 0x383   :  { %v1198_v43 = vadd.f32 %v1197_v40, %v1196_v34 }
 0x384   :  { %v1177_v20 = vadd.f32 %v1176_v26, %v1175_v25  ;;  %vm1166_vm1 = vcmp.ne.f32.partialorder %v1165_v39, %v1165_v39 }
 0x385   :  { %v1167_v44 = vsel %vm1166_vm1, 0.0001, %v1165_v39 }
 0x386   :  { %1228 = vpush %v1177_v20 }
 0x392   :  { %v1181_v31 = vpop.xlane.xlu0 %1180 }
 0x393   :  { %v1182_v32 = vrot.slane %v1181_v31, 4 }
 0x395   :  { %v1183_v33 = vadd.f32 %v1182_v32, %v1181_v31 }
 0x397   :  { %v1184_v37 = vrot.slane %v1183_v33, 2 }
 0x399   :  { %v1185_v38 = vadd.f32 %v1184_v37, %v1183_v33 }
 0x39b   :  { %v1186_v41 = vrot.slane %v1185_v38, 1 }
 0x39d   :  { %v1187_v42 = vadd.f32 %v1186_v41, %v1185_v38 }
 0x39f   :  { %1230 = vpush %v1187_v42 }
 0x3a0   :  { %1232 = vpush %v1198_v43 }
 0x3a1   :  { %1234 = vpush %v1157_v6 }
 0x3a2   :  { %1236 = vpush %v1167_v44 }
 0x3b7   :  { %s1229_s3 = spop %1228 }
 0x3d0   :  { %s1231_s5 = spop %1230 }
 0x3d1   :  { %s1189_s6 = sadd.f32 %s1231_s5, %s1229_s3  ;;  %s1233_s7 = spop %1232 }
 0x3d2   :  { %s1200_s8 = smul.f32 2.0, %s1233_s7  ;;  %s1235_s10 = spop %1234 }
 0x3d3   :  { %s1237_s12 = spop %1236 }
 0x3d4   :  { %s1201_s9 = ssub.f32 %s1189_s6, %s1200_s8 }
 0x3d6   :  { %s1204_s11 = sadd.f32 %s1235_s10, %s1201_s9 }
 0x3d8   :  { %s1207_s16 = ssub.f32 %s1204_s11, %s1237_s12 }
 0x3da   :  { %s1208_s17 = smul.f32 0.25, %s1207_s16 }
 0x3dc   :  { %1210 = sst [smem:[#allocation8]] %s1208_s17 }
 0x3dd   :  { %1219 = dma.smem_to_hbm %s1360_s18, 16, %s1217_s15, [#allocation4]  }
 0x3de   :  { %1353 = dma.done.wait [#allocation4], 16  }
 0x3df   :  { %1354 = vsyncadd [#allocation4], 4294967280 }
 0x3e0   :  { %1224 = sfence }
 0x3e1   :  { %1225 = vsyncpa [#allocation3], 1 }
 0x3e2   :  { %1226 = vsyncpa [#allocation6], 1 }
 0x3e3   :  { %1227 = vsyncpa [#allocation4], 1 }

</bundles_post_ra>
